<compile_context>
chip_gen: v7x
topology: tpu7x:2x2x1
jax: 0.10.0
libtpu: 0.0.40
codegen_flags: <defaults>
</compile_context>

<pallas_src>
import functools
import math

import jax
import jax.numpy as jnp
from jax import lax
from jax.experimental import pallas as pl
from jax.experimental.pallas import tpu as pltpu

LN_EPS = 1e-5
MASK_VALUE = -1e30
_VMEM_LIMIT_BYTES = 48 * 1024 * 1024


def _pick_tile(m, candidates=(512, 256, 128, 64, 32, 16, 8)):
    """Largest tile from `candidates` that divides m (falls back to full m)."""
    for c in candidates:
        if c <= m and m % c == 0:
            return c
    return m


# ----------------------------------------------------------------------------
# Kernels
# ----------------------------------------------------------------------------

def _qkv_proj_kernel(x_ref, wq_ref, wk_ref, wv_ref, q_ref, k_ref, v_ref, *, mxu_dtype):
    """Fused Q/K/V projection for one M-tile (bf16 MXU operands, f32 accumulate)."""
    xb = x_ref[...].astype(mxu_dtype)
    q_ref[...] = jnp.dot(xb, wq_ref[...], preferred_element_type=jnp.float32).astype(q_ref.dtype)
    k_ref[...] = jnp.dot(xb, wk_ref[...], preferred_element_type=jnp.float32).astype(k_ref.dtype)
    v_ref[...] = jnp.dot(xb, wv_ref[...], preferred_element_type=jnp.float32).astype(v_ref.dtype)


def _linear_kernel(x_ref, w_ref, o_ref, *, mxu_dtype):
    o_ref[...] = jnp.dot(x_ref[...].astype(mxu_dtype), w_ref[...],
                         preferred_element_type=jnp.float32).astype(o_ref.dtype)


def _rel_shift_rows(bd_raw, T):
    """In-kernel Transformer-XL rel-shift on a [T, T] score block.

    Turns bd_raw[i, m] (m = relative-embedding index) into
    scores[i, j] = bd_raw[i, (T-1 + j - i) mod T], which matches the exact TXL
    pad+reshape rel_shift on the causal region j <= i.  Implemented as a
    log2(T) barrel shifter of static lane rotations + per-row selects, so it is
    cheap VPU/XLU work that hides under the MXU matmuls.
    """
    row = lax.broadcasted_iota(jnp.int32, (T, 1), 0)
    shift = jnp.where(row + 1 == T, 0, row + 1)        # per-row roll amount (i+1) mod T
    out = bd_raw
    nbits = max(1, (T - 1).bit_length())
    for b in range(nbits):
        amt = (1 << b) % T
        if amt == 0:
            continue
        rolled = jnp.concatenate([out[:, T - amt:], out[:, :T - amt]], axis=1)
        take = ((shift >> b) & 1) == 1                 # [T, 1] bool
        out = jnp.where(take, rolled, out)
    return out


def _attn_block_kernel(*refs, n_head, d_head, scale, causal, has_mask, mxu_dtype):
    """Relative attention for one batch element, all heads, with fused
    W_o projection + residual + post-LayerNorm epilogue.

    q/k/v/rk : [T, H*dh] (heads packed along lanes)
    cb/pb    : [1, H*dh] (content / position bias, head-packed)
    x        : [T, D]    residual input
    wo       : [H*dh, D] output projection (resident, mxu_dtype)
    g/b      : [1, D]    LayerNorm params
    o        : [T, D]
    """
    if has_mask:
        (q_ref, k_ref, v_ref, rk_ref, cb_ref, pb_ref, x_ref,
         wo_ref, g_ref, b_ref, mask_ref, o_ref) = refs
    else:
        (q_ref, k_ref, v_ref, rk_ref, cb_ref, pb_ref, x_ref,
         wo_ref, g_ref, b_ref, o_ref) = refs
        mask_ref = None

    T = q_ref.shape[0]
    H, dh = n_head, d_head

    q = q_ref[...].astype(jnp.float32)
    k = k_ref[...]                                    # mxu_dtype
    v = v_ref[...]
    rk = rk_ref[...]
    qc = (q + cb_ref[...]).astype(mxu_dtype)          # content stream  (q + r_w_bias)
    qp = (q + pb_ref[...]).astype(mxu_dtype)          # position stream (q + r_r_bias)

    # additive mask (f32), causal mask generated in-kernel from iota (no HBM buffer)
    mask_add = None
    if causal:
        row = lax.broadcasted_iota(jnp.int32, (T, T), 0)
        col = lax.broadcasted_iota(jnp.int32, (T, T), 1)
        mask_add = jnp.where(col > row, MASK_VALUE, 0.0).astype(jnp.float32)
    if mask_ref is not None:
        m = mask_ref[...]
        mask_add = m if mask_add is None else mask_add + m

    dn = (((1,), (1,)), ((), ()))                     # contract the dh axis
    outs = []
    for h in range(H):                                # static unroll over heads
        sl = slice(h * dh, (h + 1) * dh)
        # AC term: (q + content_bias) @ k^T         -> MXU
        ac = lax.dot_general(qc[:, sl], k[:, sl], dn, preferred_element_type=jnp.float32)
        # BD term: (q + position_bias) @ r_k^T      -> MXU, then in-kernel rel_shift
        bd_raw = lax.dot_general(qp[:, sl], rk[:, sl], dn, preferred_element_type=jnp.float32)
        bd = _rel_shift_rows(bd_raw, T)

        s = (ac + bd) * scale
        if mask_add is not None:
            s = s + mask_add
        s = s - jnp.max(s, axis=-1, keepdims=True)
        p = jnp.exp(s)
        p = p * pl.reciprocal(jnp.sum(p, axis=-1, keepdims=True), approx=True)  # EUP rcp
        outs.append(jnp.dot(p.astype(mxu_dtype), v[:, sl],
                            preferred_element_type=jnp.float32))                # [T, dh]

    attn_vec = jnp.concatenate(outs, axis=1)          # [T, H*dh] f32

    # fused epilogue: out = LayerNorm(x + attn_vec @ W_o)
    y = x_ref[...].astype(jnp.float32) + jnp.dot(
        attn_vec.astype(mxu_dtype), wo_ref[...], preferred_element_type=jnp.float32)
    mu = jnp.mean(y, axis=-1, keepdims=True)
    var = jnp.mean(jnp.square(y - mu), axis=-1, keepdims=True)
    o_ref[...] = ((y - mu) * lax.rsqrt(var + LN_EPS) * g_ref[...] + b_ref[...]).astype(o_ref.dtype)


def _mlp_kernel(y_ref, w1_ref, b1_ref, w2_ref, b2_ref, g_ref, b_ref, o_ref, *, mxu_dtype):
    """out = LayerNorm(y + W2 @ relu(W1 @ y + b1) + b2)  for one M-tile."""
    y = y_ref[...].astype(jnp.float32)
    h = jnp.dot(y.astype(mxu_dtype), w1_ref[...], preferred_element_type=jnp.float32) + b1_ref[...]
    h = jnp.maximum(h, 0.0)
    m = jnp.dot(h.astype(mxu_dtype), w2_ref[...], preferred_element_type=jnp.float32) + b2_ref[...]
    z = y + m
    mu = jnp.mean(z, axis=-1, keepdims=True)
    var = jnp.mean(jnp.square(z - mu), axis=-1, keepdims=True)
    o_ref[...] = ((z - mu) * lax.rsqrt(var + LN_EPS) * g_ref[...] + b_ref[...]).astype(o_ref.dtype)


# ----------------------------------------------------------------------------
# pallas_call wrappers
# ----------------------------------------------------------------------------

def _qkv_proj(x2, wq, wk, wv, *, mxu_dtype):
    M, D = x2.shape
    HD = wq.shape[1]
    TM = _pick_tile(M)
    act_spec = pl.BlockSpec((TM, D), lambda i: (i, 0))
    w_spec = pl.BlockSpec((D, HD), lambda i: (0, 0))      # resident weights
    out_spec = pl.BlockSpec((TM, HD), lambda i: (i, 0))
    return pl.pallas_call(
        functools.partial(_qkv_proj_kernel, mxu_dtype=mxu_dtype),
        out_shape=tuple(jax.ShapeDtypeStruct((M, HD), mxu_dtype) for _ in range(3)),
        grid=(M // TM,),
        in_specs=[act_spec, w_spec, w_spec, w_spec],
        out_specs=(out_spec, out_spec, out_spec),
        compiler_params=pltpu.CompilerParams(
            dimension_semantics=("parallel",), vmem_limit_bytes=_VMEM_LIMIT_BYTES),
    )(x2, wq, wk, wv)


def _linear(x, w, *, mxu_dtype, out_dtype):
    M, D = x.shape
    N = w.shape[1]
    TM = _pick_tile(M)
    return pl.pallas_call(
        functools.partial(_linear_kernel, mxu_dtype=mxu_dtype),
        out_shape=jax.ShapeDtypeStruct((M, N), out_dtype),
        grid=(M // TM,),
        in_specs=[pl.BlockSpec((TM, D), lambda i: (i, 0)),
                  pl.BlockSpec((D, N), lambda i: (0, 0))],
        out_specs=pl.BlockSpec((TM, N), lambda i: (i, 0)),
        compiler_params=pltpu.CompilerParams(
            dimension_semantics=("parallel",), vmem_limit_bytes=_VMEM_LIMIT_BYTES),
    )(x, w)


def _rel_attention_block(q, k, v, rk, cb, pb, x, wo, ln_g, ln_b, mask_add,
                         *, n_head, d_head, causal, mxu_dtype):
    B, T, HD = q.shape
    D = x.shape[-1]
    has_mask = mask_add is not None
    kern = functools.partial(
        _attn_block_kernel, n_head=n_head, d_head=d_head,
        scale=1.0 / math.sqrt(d_head), causal=causal, has_mask=has_mask,
        mxu_dtype=mxu_dtype)

    in_specs = [
        pl.BlockSpec((None, T, HD), lambda bb: (bb, 0, 0)),   # q
        pl.BlockSpec((None, T, HD), lambda bb: (bb, 0, 0)),   # k
        pl.BlockSpec((None, T, HD), lambda bb: (bb, 0, 0)),   # v
        pl.BlockSpec((T, HD), lambda bb: (0, 0)),             # rel keys (shared)
        pl.BlockSpec((1, HD), lambda bb: (0, 0)),             # content bias
        pl.BlockSpec((1, HD), lambda bb: (0, 0)),             # position bias
        pl.BlockSpec((None, T, D), lambda bb: (bb, 0, 0)),    # residual x
        pl.BlockSpec((HD, D), lambda bb: (0, 0)),             # W_o (resident)
        pl.BlockSpec((1, D), lambda bb: (0, 0)),              # ln gamma
        pl.BlockSpec((1, D), lambda bb: (0, 0)),              # ln beta
    ]
    args = [q, k, v, rk, cb, pb, x, wo, ln_g, ln_b]
    if has_mask:
        in_specs.append(pl.BlockSpec((T, T), lambda bb: (0, 0)))
        args.append(mask_add)

    return pl.pallas_call(
        kern,
        out_shape=jax.ShapeDtypeStruct((B, T, D), jnp.float32),
        grid=(B,),
        in_specs=in_specs,
        out_specs=pl.BlockSpec((None, T, D), lambda bb: (bb, 0, 0)),
        compiler_params=pltpu.CompilerParams(
            dimension_semantics=("parallel",), vmem_limit_bytes=_VMEM_LIMIT_BYTES),
    )(*args)


def _mlp(y, w1, b1, w2, b2, ln_g, ln_b, *, mxu_dtype):
    M, D = y.shape
    DI = w1.shape[1]
    TM = _pick_tile(M)
    return pl.pallas_call(
        functools.partial(_mlp_kernel, mxu_dtype=mxu_dtype),
        out_shape=jax.ShapeDtypeStruct((M, D), jnp.float32),
        grid=(M // TM,),
        in_specs=[pl.BlockSpec((TM, D), lambda i: (i, 0)),
                  pl.BlockSpec((D, DI), lambda i: (0, 0)),
                  pl.BlockSpec((1, DI), lambda i: (0, 0)),
                  pl.BlockSpec((DI, D), lambda i: (0, 0)),
                  pl.BlockSpec((1, D), lambda i: (0, 0)),
                  pl.BlockSpec((1, D), lambda i: (0, 0)),
                  pl.BlockSpec((1, D), lambda i: (0, 0))],
        out_specs=pl.BlockSpec((TM, D), lambda i: (i, 0)),
        compiler_params=pltpu.CompilerParams(
            dimension_semantics=("parallel",), vmem_limit_bytes=_VMEM_LIMIT_BYTES),
    )(y, w1, b1, w2, b2, ln_g, ln_b)


# ----------------------------------------------------------------------------
# Parameters & forward
# ----------------------------------------------------------------------------

def init_params(key, d_model, n_head, d_head):
    d_inner = 4 * d_model
    d_attn = n_head * d_head
    ks = jax.random.split(key, 6)
    s = 0.02
    return {
        "w_qkv": s * jax.random.normal(ks[0], (d_model, 3 * d_attn), jnp.float32),
        "w_r":   s * jax.random.normal(ks[1], (d_model, d_attn), jnp.float32),
        "w_o":   s * jax.random.normal(ks[2], (d_attn, d_model), jnp.float32),
        "ln1_g": jnp.ones((d_model,), jnp.float32),
        "ln1_b": jnp.zeros((d_model,), jnp.float32),
        "w1":    s * jax.random.normal(ks[3], (d_model, d_inner), jnp.float32),
        "b1":    s * jax.random.normal(ks[4], (d_inner,), jnp.float32),
        "w2":    s * jax.random.normal(ks[5], (d_inner, d_model), jnp.float32),
        "b2":    jnp.zeros((d_model,), jnp.float32),
        "ln2_g": jnp.ones((d_model,), jnp.float32),
        "ln2_b": jnp.zeros((d_model,), jnp.float32),
    }


def block_forward(params, x, relative_pos, content_bias, position_bias,
                  attn_mask=None, *, causal=False, mxu_dtype=jnp.bfloat16):
    """x: [B, T, D]; relative_pos: [T, D]; content/position bias: [H, dh];
    attn_mask: optional bool [T, T] (True = masked); causal=True generates the
    standard TXL causal mask inside the kernel (no [T,T] HBM buffer)."""
    B, T, D = x.shape
    H, dh = content_bias.shape
    HD = H * dh

    x2 = x.reshape(B * T, D).astype(jnp.float32)

    # Weights cast once to the MXU dtype (bf16: half the HBM/VMEM, full MXU rate).
    wq, wk, wv = jnp.split(params["w_qkv"].astype(mxu_dtype), 3, axis=1)
    w_r = params["w_r"].astype(mxu_dtype)
    w_o = params["w_o"].astype(mxu_dtype)
    w1 = params["w1"].astype(mxu_dtype)
    w2 = params["w2"].astype(mxu_dtype)

    # ---- projections (tiled Pallas matmuls, head-packed lane layout, no transposes) ----
    q2, k2, v2 = _qkv_proj(x2, wq, wk, wv, mxu_dtype=mxu_dtype)
    rk = _linear(relative_pos.astype(jnp.float32), w_r, mxu_dtype=mxu_dtype, out_dtype=mxu_dtype)

    q = q2.reshape(B, T, HD)
    k = k2.reshape(B, T, HD)
    v = v2.reshape(B, T, HD)

    mask_add = None
    if attn_mask is not None:
        mask_add = jnp.where(attn_mask, MASK_VALUE, 0.0).astype(jnp.float32)

    cb = content_bias.reshape(1, HD).astype(jnp.float32)
    pb = position_bias.reshape(1, HD).astype(jnp.float32)

    # ---- attention (+ fused W_o projection, residual, post-LN) ----
    out1 = _rel_attention_block(
        q, k, v, rk, cb, pb, x.astype(jnp.float32), w_o,
        params["ln1_g"].reshape(1, D), params["ln1_b"].reshape(1, D),
        mask_add, n_head=H, d_head=dh, causal=causal, mxu_dtype=mxu_dtype)   # [B, T, D]

    # ---- MLP (+ residual, post-LN), tiled over B*T ----
    d_inner = params["w1"].shape[1]
    out2 = _mlp(out1.reshape(B * T, D), w1,
                params["b1"].reshape(1, d_inner), w2, params["b2"].reshape(1, D),
                params["ln2_g"].reshape(1, D), params["ln2_b"].reshape(1, D),
                mxu_dtype=mxu_dtype)
    return out2.reshape(B, T, D)


# ----------------------------------------------------------------------------
# Pure-JAX reference (exact Transformer-XL math incl. pad+reshape rel_shift)
# ----------------------------------------------------------------------------

def reference_block(params, x, relative_pos, content_bias, position_bias, attn_mask):
    B, T, D = x.shape
    H, dh = content_bias.shape

    def ln(z, g, b):
        mu = z.mean(-1, keepdims=True)
        var = ((z - mu) ** 2).mean(-1, keepdims=True)
        return (z - mu) / jnp.sqrt(var + LN_EPS) * g + b

    qkv = (x.reshape(B * T, D) @ params["w_qkv"]).reshape(B, T, 3, H, dh)
    q, k, v = qkv[:, :, 0], qkv[:, :, 1], qkv[:, :, 2]
    r_k = (relative_pos @ params["w_r"]).reshape(T, H, dh)

    ac = jnp.einsum("bihd,bjhd->bhij", q + content_bias, k)
    bd = jnp.einsum("bihd,jhd->bhij", q + position_bias, r_k)
    zp = jnp.zeros((B, H, T, 1), bd.dtype)
    bdp = jnp.concatenate([zp, bd], axis=-1).reshape(B, H, T + 1, T)
    bd = bdp[:, :, 1:, :].reshape(B, H, T, T)

    s = (ac + bd) / jnp.sqrt(jnp.float32(dh))
    s = jnp.where(attn_mask[None, None], MASK_VALUE, s)
    p = jax.nn.softmax(s, axis=-1)
    av = jnp.einsum("bhij,bjhd->bihd", p, v).reshape(B * T, H * dh)

    out1 = ln(x.reshape(B * T, D) + av @ params["w_o"], params["ln1_g"], params["ln1_b"])
    h = jax.nn.relu(out1 @ params["w1"] + params["b1"])
    out2 = ln(out1 + h @ params["w2"] + params["b2"], params["ln2_g"], params["ln2_b"])
    return out2.reshape(B, T, D)


# ----------------------------------------------------------------------------

if __name__ == "__main__":
    B, T = 2, 8
    n_head, d_model, d_head = 4, 32, 8

    key = jax.random.PRNGKey(0)
    k_in, k_rel, k_cb, k_pb, k_par = jax.random.split(key, 5)

    x = jax.random.normal(k_in, (B, T, d_model), jnp.float32)
    relative_pos = jax.random.normal(k_rel, (T, d_model), jnp.float32)
    content_bias = 0.02 * jax.random.normal(k_cb, (n_head, d_head), jnp.float32)
    position_bias = 0.02 * jax.random.normal(k_pb, (n_head, d_head), jnp.float32)
    params = init_params(k_par, d_model, n_head, d_head)

    # standard TXL causal mask (True = masked / future position)
    attn_mask = jnp.triu(jnp.ones((T, T), dtype=bool), k=1)
    ref = reference_block(params, x, relative_pos, content_bias, position_bias, attn_mask)

    # Path 1: causal mask generated inside the kernel (no [T,T] HBM mask buffer).
    out = jax.block_until_ready(
        block_forward(params, x, relative_pos, content_bias, position_bias,
                      attn_mask=None, causal=True))
    # Path 2: explicit additive mask array (exercises the has_mask code path).
    out_m = jax.block_until_ready(
        block_forward(params, x, relative_pos, content_bias, position_bias,
                      attn_mask=attn_mask))

    assert out.shape == (B, T, d_model), out.shape
    # tolerance reflects bf16 MXU operands vs the f32 reference
    err1 = float(jnp.max(jnp.abs(out - ref)))
    err2 = float(jnp.max(jnp.abs(out_m - ref)))
    assert jnp.allclose(out, ref, atol=1e-2, rtol=1e-2), f"max_err={err1}"
    assert jnp.allclose(out_m, ref, atol=1e-2, rtol=1e-2), f"max_err={err2}"
    print("KERNEL_OK")
</pallas_src>

<mosaic_0001>
module attributes {stable_mosaic.version = 11 : i64} {
  func.func @_qkv_proj_kernel(%arg0: i32, %arg1: memref<16x32xf32, #tpu.memory_space<vmem>>, %arg2: memref<32x32xbf16, #tpu.memory_space<vmem>>, %arg3: memref<32x32xbf16, #tpu.memory_space<vmem>>, %arg4: memref<32x32xbf16, #tpu.memory_space<vmem>>, %arg5: memref<16x32xbf16, #tpu.memory_space<vmem>>, %arg6: memref<16x32xbf16, #tpu.memory_space<vmem>>, %arg7: memref<16x32xbf16, #tpu.memory_space<vmem>>) attributes {dimension_semantics = [#tpu.dimension_semantics<parallel>], iteration_bounds = array<i64: 1>, scalar_prefetch = 0 : i64, scratch_operands = 0 : i64, tpu.core_type = #tpu.core_type<tc>, window_params = [{transform_indices = @transform_0, window_bounds = array<i64: 16, 32>}, {pipeline_mode = #tpu.pipeline_mode<synchronous>, transform_indices = @transform_1, window_bounds = array<i64: 32, 32>}, {pipeline_mode = #tpu.pipeline_mode<synchronous>, transform_indices = @transform_2, window_bounds = array<i64: 32, 32>}, {pipeline_mode = #tpu.pipeline_mode<synchronous>, transform_indices = @transform_3, window_bounds = array<i64: 32, 32>}, {transform_indices = @transform_4, window_bounds = array<i64: 16, 32>}, {transform_indices = @transform_5, window_bounds = array<i64: 16, 32>}, {transform_indices = @transform_6, window_bounds = array<i64: 16, 32>}]} {
    %c0 = arith.constant 0 : index
    %c0_0 = arith.constant 0 : index
    %0 = vector.load %arg1[%c0, %c0_0] : memref<16x32xf32, #tpu.memory_space<vmem>>, vector<16x32xf32>
    %1 = arith.truncf %0 : vector<16x32xf32> to vector<16x32xbf16>
    %c0_1 = arith.constant 0 : index
    %c0_2 = arith.constant 0 : index
    %2 = vector.load %arg2[%c0_1, %c0_2] : memref<32x32xbf16, #tpu.memory_space<vmem>>, vector<32x32xbf16>
    %cst = arith.constant dense<0.000000e+00> : vector<16x32xf32>
    %3 = tpu.matmul %1, %2, %cst {dimension_numbers = #tpu.dot_dimension_numbers<[1], [0], [0], [1], [0, 0, 1, 1], [], []>} : vector<16x32xbf16>, vector<32x32xbf16>, vector<16x32xf32> -> vector<16x32xf32>
    %4 = arith.truncf %3 : vector<16x32xf32> to vector<16x32xbf16>
    %c0_3 = arith.constant 0 : index
    %c0_4 = arith.constant 0 : index
    %5 = vector.load %arg5[%c0_3, %c0_4] : memref<16x32xbf16, #tpu.memory_space<vmem>>, vector<16x32xbf16>
    tpu.vector_store %arg5[%c0_3, %c0_4], %4 {strides = array<i32>} : memref<16x32xbf16, #tpu.memory_space<vmem>>, vector<16x32xbf16>,
    %c0_5 = arith.constant 0 : index
    %c0_6 = arith.constant 0 : index
    %6 = vector.load %arg3[%c0_5, %c0_6] : memref<32x32xbf16, #tpu.memory_space<vmem>>, vector<32x32xbf16>
    %cst_7 = arith.constant dense<0.000000e+00> : vector<16x32xf32>
    %7 = tpu.matmul %1, %6, %cst_7 {dimension_numbers = #tpu.dot_dimension_numbers<[1], [0], [0], [1], [0, 0, 1, 1], [], []>} : vector<16x32xbf16>, vector<32x32xbf16>, vector<16x32xf32> -> vector<16x32xf32>
    %8 = arith.truncf %7 : vector<16x32xf32> to vector<16x32xbf16>
    %c0_8 = arith.constant 0 : index
    %c0_9 = arith.constant 0 : index
    %9 = vector.load %arg6[%c0_8, %c0_9] : memref<16x32xbf16, #tpu.memory_space<vmem>>, vector<16x32xbf16>
    tpu.vector_store %arg6[%c0_8, %c0_9], %8 {strides = array<i32>} : memref<16x32xbf16, #tpu.memory_space<vmem>>, vector<16x32xbf16>,
    %c0_10 = arith.constant 0 : index
    %c0_11 = arith.constant 0 : index
    %10 = vector.load %arg4[%c0_10, %c0_11] : memref<32x32xbf16, #tpu.memory_space<vmem>>, vector<32x32xbf16>
    %cst_12 = arith.constant dense<0.000000e+00> : vector<16x32xf32>
    %11 = tpu.matmul %1, %10, %cst_12 {dimension_numbers = #tpu.dot_dimension_numbers<[1], [0], [0], [1], [0, 0, 1, 1], [], []>} : vector<16x32xbf16>, vector<32x32xbf16>, vector<16x32xf32> -> vector<16x32xf32>
    %12 = arith.truncf %11 : vector<16x32xf32> to vector<16x32xbf16>
    %c0_13 = arith.constant 0 : index
    %c0_14 = arith.constant 0 : index
    %13 = vector.load %arg7[%c0_13, %c0_14] : memref<16x32xbf16, #tpu.memory_space<vmem>>, vector<16x32xbf16>
    tpu.vector_store %arg7[%c0_13, %c0_14], %12 {strides = array<i32>} : memref<16x32xbf16, #tpu.memory_space<vmem>>, vector<16x32xbf16>,
    return
  }
  func.func @transform_0(%arg0: i32) -> (i32, i32) {
    %c0_i32 = arith.constant 0 : i32
    %c0_i32_0 = arith.constant 0 : i32
    return %arg0, %c0_i32 : i32, i32
  }
  func.func @transform_1(%arg0: i32) -> (i32, i32) {
    %c0_i32 = arith.constant 0 : i32
    %c0_i32_0 = arith.constant 0 : i32
    %c0_i32_1 = arith.constant 0 : i32
    return %c0_i32, %c0_i32_0 : i32, i32
  }
  func.func @transform_2(%arg0: i32) -> (i32, i32) {
    %c0_i32 = arith.constant 0 : i32
    %c0_i32_0 = arith.constant 0 : i32
    %c0_i32_1 = arith.constant 0 : i32
    return %c0_i32, %c0_i32_0 : i32, i32
  }
  func.func @transform_3(%arg0: i32) -> (i32, i32) {
    %c0_i32 = arith.constant 0 : i32
    %c0_i32_0 = arith.constant 0 : i32
    %c0_i32_1 = arith.constant 0 : i32
    return %c0_i32, %c0_i32_0 : i32, i32
  }
  func.func @transform_4(%arg0: i32) -> (i32, i32) {
    %c0_i32 = arith.constant 0 : i32
    %c0_i32_0 = arith.constant 0 : i32
    return %arg0, %c0_i32 : i32, i32
  }
  func.func @transform_5(%arg0: i32) -> (i32, i32) {
    %c0_i32 = arith.constant 0 : i32
    %c0_i32_0 = arith.constant 0 : i32
    return %arg0, %c0_i32 : i32, i32
  }
  func.func @transform_6(%arg0: i32) -> (i32, i32) {
    %c0_i32 = arith.constant 0 : i32
    %c0_i32_0 = arith.constant 0 : i32
    return %arg0, %c0_i32 : i32, i32
  }
}

</mosaic_0001>

<bundles_post_ra>
// kernel: tpu_custom_call.1
= control target key start
LH: loop header
LB: loop body
LE: loop exit
PB: predicated region body
PF: predicated region fallthrough
CT: control target
= control target key end

     0   :  { %12 = vsyncpa [#allocation3], 0  ;;  %s747_s0 = inlined_call_operand.hbm [shape: f32[16,32], index: 0, kind: input, shape index: {}]   ;;  %s748_s1 = inlined_call_operand.hbm [shape: bf16[32,32], index: 1, kind: input, shape index: {}]   ;;  %s749_s2 = inlined_call_operand.hbm [shape: bf16[32,32], index: 2, kind: input, shape index: {}]   ;;  %s750_s3 = inlined_call_operand.hbm [shape: bf16[32,32], index: 3, kind: input, shape index: {}]   ;;  %s751_s4 = inlined_call_operand.hbm [shape: bf16[16,32], index: 4, kind: output, shape index: {0}]   ;;  %s752_s5 = inlined_call_operand.hbm [shape: bf16[16,32], index: 5, kind: output, shape index: {1}]   ;;  %s753_s6 = inlined_call_operand.hbm [shape: bf16[16,32], index: 6, kind: output, shape index: {2}]  }
   0x1   :  { %13 = vsyncpa [#allocation6], 0 }
   0x2   :  { %14 = vsyncpa [#allocation9], 0 }
   0x3   :  { %15 = vsyncpa [#allocation4], 0 }
   0x4   :  { %16 = vsyncpa [#allocation12], 0  ;;  %s574_s21 = smov [#allocation5]   ;;  %s410_s25 = scalar_lea.hbm %s748_s1, 256 }
   0x5   :  { %s34_s22 = sshll.u32 %s574_s21, 4  ;;  %p411_p0 = scmp.ne.s32.totalorder %s748_s1, %s410_s25  ;;  %s35_s22 = int_to_ptr.vmem [resolvable:$true] %s34_s22 }
   0x6   :  { %p414_p1 = scmp.lt.u32.totalorder %s410_s25, %s748_s1 }
   0x8   :  { %p416_p2 = pnand %p414_p1, %p411_p0 }
   0xa   :  { %419 = shalt.err (!%p416_p2)
}
   0xb   :  { %s420_s30 = scalar_lea.vmem %s35_s22, 256  ;;  %p425_p4 = scmp.lt.s32.totalorder %s35_s22, %s35_s22 }
   0xc   :  { %p421_p3 = scmp.ne.s32.totalorder %s35_s22, %s420_s30  ;;  %p426_p5 = scmp.lt.s32.totalorder %s420_s30, %s420_s30 }
   0xe   :  { %p427_p6 = por %p426_p5, %p425_p4 }
  0x10   :  { %p428_p7 = pnand %p427_p6, %p421_p3 }
  0x12   :  { %431 = shalt.err (!%p428_p7)
}
  0x13   :  { %s575_s7 = smov 64   ;;  %s576_s8 = smov 4  }
  0x14   :  { %40 = dma.hbm_to_vmem [thread:$0]  %s748_s1, 256, %s35_s22, [#allocation6], %s575_s7, %s575_s7, %s576_s8  }
  0x15   :  { %s577_s11 = smov [#allocation2]   ;;  %s432_s15 = scalar_lea.hbm %s747_s0, 256 }
  0x16   :  { %s22_s12 = sshll.u32 %s577_s11, 4  ;;  %p433_p8 = scmp.ne.s32.totalorder %s747_s0, %s432_s15  ;;  %s23_s12 = int_to_ptr.vmem [resolvable:$true] %s22_s12 }
  0x17   :  { %p436_p9 = scmp.lt.u32.totalorder %s432_s15, %s747_s0 }
  0x19   :  { %p438_p10 = pnand %p436_p9, %p433_p8 }
  0x1b   :  { %441 = shalt.err (!%p438_p10)
}
  0x1c   :  { %s442_s20 = scalar_lea.vmem %s23_s12, 256  ;;  %p447_p12 = scmp.lt.s32.totalorder %s23_s12, %s23_s12 }
  0x1d   :  { %p443_p11 = scmp.ne.s32.totalorder %s23_s12, %s442_s20  ;;  %p448_p13 = scmp.lt.s32.totalorder %s442_s20, %s442_s20 }
  0x1f   :  { %p449_p0 = por %p448_p13, %p447_p12 }
  0x21   :  { %p450_p1 = pnand %p449_p0, %p443_p11 }
  0x23   :  { %453 = shalt.err (!%p450_p1)
}
  0x24   :  { %s578_s1 = smov 128   ;;  %s579_s21 = smov 8  }
  0x25   :  { %28 = dma.hbm_to_vmem [thread:$0]  %s747_s0, 256, %s23_s12, [#allocation3], %s578_s1, %s578_s1, %s579_s21  }
  0x26   :  { %s580_s24 = smov [#allocation7]   ;;  %s581_s26 = smov [#allocation8]  }
  0x27   :  { %s46_s25 = sshll.u32 %s580_s24, 4  ;;  %s58_s27 = sshll.u32 %s581_s26, 4  ;;  %s47_s25 = int_to_ptr.vmem [resolvable:$true] %s46_s25  ;;  %s649_s27 = int_to_ptr.vmem [resolvable:$true] %s58_s27 }
  0x28   :  { %s454_s30 = scalar_lea.hbm %s749_s2, 256 }
  0x29   :  { %p455_p2 = scmp.ne.s32.totalorder %s749_s2, %s454_s30  ;;  %p458_p3 = scmp.lt.u32.totalorder %s454_s30, %s749_s2 }
  0x2b   :  { %p460_p4 = pnand %p458_p3, %p455_p2 }
  0x2d   :  { %463 = shalt.err (!%p460_p4)
}
  0x2e   :  { %s464_s0 = scalar_lea.vmem %s47_s25, 256  ;;  %p469_p6 = scmp.lt.s32.totalorder %s47_s25, %s47_s25 }
  0x2f   :  { %p465_p5 = scmp.ne.s32.totalorder %s47_s25, %s464_s0  ;;  %p470_p7 = scmp.lt.s32.totalorder %s464_s0, %s464_s0 }
  0x31   :  { %p471_p8 = por %p470_p7, %p469_p6 }
  0x33   :  { %p472_p9 = pnand %p471_p8, %p465_p5 }
  0x35   :  { %475 = shalt.err (!%p472_p9)
}
  0x36   :  { %52 = dma.hbm_to_vmem [thread:$0]  %s749_s2, 256, %s47_s25, [#allocation6], %s575_s7, %s575_s7, %s576_s8  }
  0x37   :  { %s476_s17 = scalar_lea.hbm %s750_s3, 256 }
  0x38   :  { %p477_p10 = scmp.ne.s32.totalorder %s750_s3, %s476_s17  ;;  %p480_p11 = scmp.lt.u32.totalorder %s476_s17, %s750_s3 }
  0x3a   :  { %p482_p12 = pnand %p480_p11, %p477_p10 }
  0x3c   :  { %485 = shalt.err (!%p482_p12)
}
  0x3d   :  { %s486_s21 = scalar_lea.vmem %s649_s27, 256  ;;  %p491_p0 = scmp.lt.s32.totalorder %s649_s27, %s649_s27 }
  0x3e   :  { %p487_p13 = scmp.ne.s32.totalorder %s649_s27, %s486_s21  ;;  %p492_p1 = scmp.lt.s32.totalorder %s486_s21, %s486_s21 }
  0x40   :  { %p493_p2 = por %p492_p1, %p491_p0 }
  0x42   :  { %p494_p3 = pnand %p493_p2, %p487_p13 }
  0x44   :  { %497 = shalt.err (!%p494_p3)
}
  0x45   :  { %64 = dma.hbm_to_vmem [thread:$0]  %s750_s3, 256, %s649_s27, [#allocation9], %s575_s7, %s575_s7, %s576_s8  }
  0x46   :  { %564 = dma.done.wait [#allocation3], 256  }
  0x47   :  { %565 = vsyncadd [#allocation3], 4294967040 }
  0x48   :  { %566 = dma.done.wait [#allocation6], 512  }
  0x49   :  { %567 = vsyncadd [#allocation6], 4294966784 }
  0x4a   :  { %568 = dma.done.wait [#allocation9], 256  }
  0x4b   :  { %569 = vsyncadd [#allocation9], 4294967040  ;;  %v582_v0 = vmov 0.0   ;;  %vm583_vm0 = vmmov 0   ;;  %v404_v1 = vld [vmem:[#allocation5] sm:$0xff]   ;;  %v405_v2 = vld [vmem:[#allocation5 + $0x8] sm:$0xff]  }
  0x4c   :  { %367 = vmatprep.subr.bf16.mxu0 %v582_v0  ;;  %375 = vmatprep.subr.bf16.mxu1 %v582_v0  ;;  %v406_v3 = vld [vmem:[#allocation7] sm:$0xff]   ;;  %v79_v5 = vld [vmem:[#allocation2 + $0x8] sm:$0xff]  ;;  %vm97_vm1 = vcmask 261120   ;;  %v407_v8 = vld [vmem:[#allocation8] sm:$0xff]   ;;  %vm150_vm2 = vcmask 257024   ;;  %s584_s3 = smov [#allocation10]  }
  0x4d   :  { %371 = vmatprep.mubr.msk.bf16.mxu0 %vm583_vm0, %v582_v0  ;;  %379 = vmatprep.mubr.msk.bf16.mxu1 %vm583_vm0, %v582_v0  ;;  %v78_v4 = vld [vmem:[#allocation2] sm:$0xff]  ;;  %v408_v7 = vld [vmem:[#allocation7 + $0x8] sm:$0xff]   ;;  %v409_v9 = vld [vmem:[#allocation8 + $0x8] sm:$0xff]   ;;  %s292_s23 = sshll.u32 %s584_s3, 4  ;;  %s585_s24 = smov [#allocation11]   ;;  %s293_s23 = int_to_ptr.vmem [resolvable:$true] %s292_s23 }
  0x4e   :  { %368 = vmatpush3.bf16.msra.mxu0 %v404_v1  ;;  %376 = vmatpush3.bf16.msra.mxu1 %v406_v3  ;;  %v80_v6 = vpack.c.bf16 %v79_v5, %v78_v4  ;;  %s304_s25 = sshll.u32 %s585_s24, 4  ;;  %s498_s26 = scalar_lea.vmem %s293_s23, 128  ;;  %s692_s25 = int_to_ptr.vmem [resolvable:$true] %s304_s25 }
  0x4f   :  { %369 = vmatprep.subr.bf16.mxu0 %v582_v0  ;;  %377 = vmatprep.subr.bf16.mxu1 %v582_v0  ;;  %p499_p4 = scmp.ne.s32.totalorder %s293_s23, %s498_s26  ;;  %p503_p5 = scmp.lt.s32.totalorder %s293_s23, %s293_s23 }
  0x50   :  { %p504_p6 = scmp.lt.s32.totalorder %s498_s26, %s498_s26 }
  0x52   :  { %370 = vmatpush3.bf16.msra.mxu0 %v405_v2  ;;  %378 = vmatpush3.bf16.msra.mxu1 %v408_v7  ;;  %p505_p7 = por %p504_p6, %p503_p5 }
  0x53   :  { %383 = vmatprep.subr.bf16.mxu0 %v582_v0 }
  0x54   :  { %p506_p8 = pnand %p505_p7, %p499_p4 }
  0x55   :  { %372 = vmatmul.mubr.msk.bf16.vlgmr.msra.gmra.mrb[0].mxu0 %vm97_vm1, %v80_v6  ;;  %380 = vmatmul.mubr.msk.bf16.vlgmr.msra.gmra.mrb[0].mxu1 %vm97_vm1, %v80_v6 }
  0x56   :  { %384 = vmatpush3.bf16.msra.mxu0 %v407_v8  ;;  %387 = vmatprep.mubr.msk.bf16.mxu0 %vm583_vm0, %v582_v0 }
  0x57   :  { %385 = vmatprep.subr.bf16.mxu0 %v582_v0 }
  0x5a   :  { %386 = vmatpush3.bf16.msra.mxu0 %v409_v9 }
  0x5d   :  { %388 = vmatmul.mubr.msk.bf16.vlgmr.msra.gmra.mrb[4].mxu0 %vm97_vm1, %v80_v6 }
 0x128   :  { %v135_v10 = vpop.f32.mrb[0].mxu0  ;;  %v203_v14 = vpop.f32.mrb[0].mxu1 }
 0x129   :  { %v352_v11 = vpack.c.bf16 %v135_v10, %v135_v10  ;;  %v373_v12 = vpop.f32.mrb[1].mxu0  ;;  %v354_v17 = vpack.c.bf16 %v203_v14, %v203_v14  ;;  %v381_v18 = vpop.f32.mrb[1].mxu1 }
 0x12a   :  { %v138_v13 = vpop.f32.mrb[2].mxu0  ;;  %v206_v19 = vpop.f32.mrb[2].mxu1 }
 0x12b   :  { %v353_v15 = vpack.c.bf16 %v138_v13, %v138_v13  ;;  %v374_v16 = vpop.f32.mrb[3].mxu0  ;;  %151 = vst.msk [vmem:[#allocation10] sm:$0xf] %vm150_vm2, %v352_v11  ;;  %v355_v20 = vpack.c.bf16 %v206_v19, %v206_v19  ;;  %v382_v21 = vpop.f32.mrb[3].mxu1  ;;  %218 = vst.msk [vmem:[#allocation11] sm:$0xf] %vm150_vm2, %v354_v17 }
 0x12d   :  { %152 = vst.msk [vmem:[#allocation10 + $0x4] sm:$0xf] %vm150_vm2, %v353_v15 }
 0x12e   :  { %509 = shalt.err (!%p506_p8)
}
 0x12f   :  { %s510_s29 = scalar_lea.hbm %s751_s4, 128 }
 0x130   :  { %p511_p9 = scmp.ne.s32.totalorder %s751_s4, %s510_s29  ;;  %p514_p10 = scmp.lt.u32.totalorder %s510_s29, %s751_s4 }
 0x132   :  { %p516_p11 = pnand %p514_p10, %p511_p9 }
 0x134   :  { %519 = shalt.err (!%p516_p11)
}
 0x135   :  { %298 = dma.vmem_to_hbm [thread:$0]  %s293_s23, 128, %s751_s4, [#allocation4], %s575_s7, %s575_s7, %s576_s8   ;;  %219 = vst.msk [vmem:[#allocation11 + $0x4] sm:$0xf] %vm150_vm2, %v355_v20  ;;  %v270_v22 = vpop.f32.mrb[4].mxu0 }
 0x136   :  { %s586_s12 = smov [#allocation13]   ;;  %s520_s15 = scalar_lea.vmem %s692_s25, 128 }
 0x137   :  { %s316_s14 = sshll.u32 %s586_s12, 4  ;;  %p521_p12 = scmp.ne.s32.totalorder %s692_s25, %s520_s15  ;;  %s317_s14 = int_to_ptr.vmem [resolvable:$true] %s316_s14 }
 0x138   :  { %p525_p13 = scmp.lt.s32.totalorder %s692_s25, %s692_s25  ;;  %p526_p0 = scmp.lt.s32.totalorder %s520_s15, %s520_s15 }
 0x13a   :  { %p527_p1 = por %p526_p0, %p525_p13 }
 0x13c   :  { %p528_p2 = pnand %p527_p1, %p521_p12 }
 0x13e   :  { %531 = shalt.err (!%p528_p2)
}
 0x13f   :  { %s532_s18 = scalar_lea.hbm %s752_s5, 128 }
 0x140   :  { %p533_p3 = scmp.ne.s32.totalorder %s752_s5, %s532_s18  ;;  %p536_p4 = scmp.lt.u32.totalorder %s532_s18, %s752_s5 }
 0x142   :  { %p538_p5 = pnand %p536_p4, %p533_p3 }
 0x144   :  { %541 = shalt.err (!%p538_p5)
}
 0x145   :  { %310 = dma.vmem_to_hbm [thread:$0]  %s692_s25, 128, %s752_s5, [#allocation12], %s575_s7, %s575_s7, %s576_s8   ;;  %v356_v23 = vpack.c.bf16 %v270_v22, %v270_v22  ;;  %v389_v24 = vpop.f32.mrb[5].mxu0 }
 0x146   :  { %v273_v25 = vpop.f32.mrb[6].mxu0  ;;  %s542_s22 = scalar_lea.vmem %s317_s14, 128  ;;  %p547_p7 = scmp.lt.s32.totalorder %s317_s14, %s317_s14 }
 0x147   :  { %285 = vst.msk [vmem:[#allocation13] sm:$0xf] %vm150_vm2, %v356_v23  ;;  %v357_v26 = vpack.c.bf16 %v273_v25, %v273_v25  ;;  %v390_v27 = vpop.f32.mrb[7].mxu0  ;;  %p543_p6 = scmp.ne.s32.totalorder %s317_s14, %s542_s22  ;;  %p548_p8 = scmp.lt.s32.totalorder %s542_s22, %s542_s22 }
 0x149   :  { %286 = vst.msk [vmem:[#allocation13 + $0x4] sm:$0xf] %vm150_vm2, %v357_v26  ;;  %p549_p9 = por %p548_p8, %p547_p7 }
 0x14b   :  { %p550_p10 = pnand %p549_p9, %p543_p6 }
 0x14d   :  { %553 = shalt.err (!%p550_p10)
}
 0x14e   :  { %s554_s5 = scalar_lea.hbm %s753_s6, 128 }
 0x14f   :  { %p555_p11 = scmp.ne.s32.totalorder %s753_s6, %s554_s5  ;;  %p558_p12 = scmp.lt.u32.totalorder %s554_s5, %s753_s6 }
 0x151   :  { %p560_p13 = pnand %p558_p12, %p555_p11 }
 0x153   :  { %563 = shalt.err (!%p560_p13)
}
 0x154   :  { %322 = dma.vmem_to_hbm [thread:$0]  %s317_s14, 128, %s753_s6, [#allocation12], %s575_s7, %s575_s7, %s576_s8  }
 0x155   :  { %570 = dma.done.wait [#allocation4], 128  }
 0x156   :  { %571 = vsyncadd [#allocation4], 4294967168 }
 0x157   :  { %572 = dma.done.wait [#allocation12], 256  }
 0x158   :  { %573 = vsyncadd [#allocation12], 4294967040 }
 0x159   :  { %332 = vsyncpa [#allocation3], 1 }
 0x15a   :  { %333 = vsyncpa [#allocation6], 1 }
 0x15b   :  { %334 = vsyncpa [#allocation9], 1 }
 0x15c   :  { %335 = vsyncpa [#allocation4], 1 }
 0x15d   :  { %336 = vsyncpa [#allocation12], 1 }

</bundles_post_ra>
